<compile_context>
chip_gen: v7x
topology: tpu7x:2x2x1
jax: 0.10.0
libtpu: 0.0.40
codegen_flags: <defaults>
</compile_context>

<pallas_src>
import jax
import jax.numpy as jnp
from jax.experimental import pallas as pl
from jax.experimental.pallas import tpu as pltpu

LANE = 128  # TPU vreg lane width


def dqn_kernel(x_ref, w1_ref, b1_ref, w2_ref, b2_ref, w3_ref, b3_ref, out_ref):
    # fc1 + tanh  (bf16 MXU operands, f32 accumulation / elementwise)
    x = x_ref[...].astype(jnp.bfloat16)
    h1 = jnp.dot(x, w1_ref[...], preferred_element_type=jnp.float32) + b1_ref[...]
    h1 = jnp.tanh(h1)
    # fc2 + tanh
    h2 = jnp.dot(h1.astype(jnp.bfloat16), w2_ref[...],
                 preferred_element_type=jnp.float32) + b2_ref[...]
    h2 = jnp.tanh(h2)
    # fc3 -> q values (output head padded to 128 lanes; padded lanes carry a
    # large negative bias so they vanish in the softmax)
    q = jnp.dot(h2.astype(jnp.bfloat16), w3_ref[...],
                preferred_element_type=jnp.float32) + b3_ref[...]
    # numerically stable softmax over the (padded) action axis
    q_max = jnp.max(q, axis=-1, keepdims=True)
    e = jnp.exp(q - q_max)
    denom = jnp.sum(e, axis=-1, keepdims=True)
    out_ref[...] = (e * pl.reciprocal(denom, approx=True)).astype(out_ref.dtype)


def _round_up(a, m):
    return (a + m - 1) // m * m


def dqn_forward(state, params, *, tile_b=128):
    """state: (B, S0, S1) float32. Returns softmax probabilities (B, action_size)."""
    w1, b1, w2, b2, w3, b3 = params
    B = state.shape[0]
    d_in = w1.shape[0]
    action_size = w3.shape[1]

    x = state.reshape(B, d_in).astype(jnp.float32)  # state.view(B, -1)

    # Batch tile: multiple of 8 sublanes, capped at tile_b; pad batch to tile.
    tb = min(tile_b, _round_up(B, 8))
    b_pad = _round_up(B, tb)
    if b_pad != B:
        x = jnp.pad(x, ((0, b_pad - B), (0, 0)))

    # Lane-dense padded head: pad fc3 to 128 output lanes; padded logits are
    # masked via a large negative bias so the softmax denominator is unchanged.
    n_pad = _round_up(action_size, LANE)
    w3p = jnp.pad(w3, ((0, 0), (0, n_pad - action_size)))
    b3p = jnp.pad(b3, ((0, 0), (0, n_pad - action_size)),
                  constant_values=jnp.float32(-1e30))

    # bf16 operands for the MXU (f32 accumulation inside the kernel).
    w1b = w1.astype(jnp.bfloat16)
    w2b = w2.astype(jnp.bfloat16)
    w3b = w3p.astype(jnp.bfloat16)

    row = lambda i: (i, 0)        # batch-tiled arrays
    const = lambda i: (0, 0)      # weights/biases: resident across grid steps

    out = pl.pallas_call(
        dqn_kernel,
        out_shape=jax.ShapeDtypeStruct((b_pad, n_pad), jnp.float32),
        grid=(b_pad // tb,),
        in_specs=[
            pl.BlockSpec((tb, d_in), row),
            pl.BlockSpec(w1b.shape, const),
            pl.BlockSpec(b1.shape, const),
            pl.BlockSpec(w2b.shape, const),
            pl.BlockSpec(b2.shape, const),
            pl.BlockSpec(w3b.shape, const),
            pl.BlockSpec(b3p.shape, const),
        ],
        out_specs=pl.BlockSpec((tb, n_pad), row),
        compiler_params=pltpu.CompilerParams(
            dimension_semantics=("parallel",)),
    )(x, w1b, b1, w2b, b2, w3b, b3p)

    return out[:B, :action_size]


def init_params(key, state_size, action_size, hidden=64):
    """PyTorch-Linear-style init: U(-1/sqrt(fan_in), 1/sqrt(fan_in)), f32."""
    d_in = state_size[0] * state_size[1]
    keys = jax.random.split(key, 6)

    def linear(kw, kb, fan_in, fan_out):
        bound = 1.0 / jnp.sqrt(jnp.float32(fan_in))
        w = jax.random.uniform(kw, (fan_in, fan_out), jnp.float32, -bound, bound)
        b = jax.random.uniform(kb, (1, fan_out), jnp.float32, -bound, bound)
        return w, b

    w1, b1 = linear(keys[0], keys[1], d_in, hidden)
    w2, b2 = linear(keys[2], keys[3], hidden, hidden)
    w3, b3 = linear(keys[4], keys[5], hidden, action_size)
    return (w1, b1, w2, b2, w3, b3)


if __name__ == "__main__":
    key = jax.random.PRNGKey(0)
    k_param, k_state = jax.random.split(key)

    state_size = (4, 16)   # flattened input dim = 64
    action_size = 8
    batch = 2

    params = init_params(k_param, state_size, action_size)
    state = jax.random.normal(k_state, (batch,) + state_size, dtype=jnp.float32)

    probs = dqn_forward(state, params)
    probs = jax.block_until_ready(probs)

    # reference in f32
    w1, b1, w2, b2, w3, b3 = params
    x = state.reshape(batch, -1)
    h = jnp.tanh(x @ w1 + b1)
    h = jnp.tanh(h @ w2 + b2)
    q = h @ w3 + b3
    ref = jax.nn.softmax(q, axis=-1)

    assert probs.shape == (batch, action_size)
    # loosened tolerances: bf16 MXU operands + approx reciprocal
    assert jnp.allclose(jnp.sum(probs, axis=-1), 1.0, atol=1e-2)
    assert jnp.allclose(probs, ref, atol=2e-2)

    print("KERNEL_OK")
</pallas_src>

<mosaic_0001>
module attributes {stable_mosaic.version = 11 : i64} {
  func.func @dqn_kernel(%arg0: i32, %arg1: memref<8x64xf32, #tpu.memory_space<vmem>>, %arg2: memref<64x64xbf16, #tpu.memory_space<vmem>>, %arg3: memref<1x64xf32, #tpu.memory_space<vmem>>, %arg4: memref<64x64xbf16, #tpu.memory_space<vmem>>, %arg5: memref<1x64xf32, #tpu.memory_space<vmem>>, %arg6: memref<64x128xbf16, #tpu.memory_space<vmem>>, %arg7: memref<1x128xf32, #tpu.memory_space<vmem>>, %arg8: memref<8x128xf32, #tpu.memory_space<vmem>>) attributes {dimension_semantics = [#tpu.dimension_semantics<parallel>], iteration_bounds = array<i64: 1>, scalar_prefetch = 0 : i64, scratch_operands = 0 : i64, tpu.core_type = #tpu.core_type<tc>, window_params = [{transform_indices = @transform_0, window_bounds = array<i64: 8, 64>}, {pipeline_mode = #tpu.pipeline_mode<synchronous>, transform_indices = @transform_1, window_bounds = array<i64: 64, 64>}, {pipeline_mode = #tpu.pipeline_mode<synchronous>, transform_indices = @transform_2, window_bounds = array<i64: 1, 64>}, {pipeline_mode = #tpu.pipeline_mode<synchronous>, transform_indices = @transform_3, window_bounds = array<i64: 64, 64>}, {pipeline_mode = #tpu.pipeline_mode<synchronous>, transform_indices = @transform_4, window_bounds = array<i64: 1, 64>}, {pipeline_mode = #tpu.pipeline_mode<synchronous>, transform_indices = @transform_5, window_bounds = array<i64: 64, 128>}, {pipeline_mode = #tpu.pipeline_mode<synchronous>, transform_indices = @transform_6, window_bounds = array<i64: 1, 128>}, {transform_indices = @transform_7, window_bounds = array<i64: 8, 128>}]} {
    %c0 = arith.constant 0 : index
    %c0_0 = arith.constant 0 : index
    %0 = vector.load %arg1[%c0, %c0_0] : memref<8x64xf32, #tpu.memory_space<vmem>>, vector<8x64xf32>
    %1 = arith.truncf %0 : vector<8x64xf32> to vector<8x64xbf16>
    %c0_1 = arith.constant 0 : index
    %c0_2 = arith.constant 0 : index
    %2 = vector.load %arg2[%c0_1, %c0_2] : memref<64x64xbf16, #tpu.memory_space<vmem>>, vector<64x64xbf16>
    %cst = arith.constant dense<0.000000e+00> : vector<8x64xf32>
    %3 = tpu.matmul %1, %2, %cst {dimension_numbers = #tpu.dot_dimension_numbers<[1], [0], [0], [1], [0, 0, 1, 1], [], []>} : vector<8x64xbf16>, vector<64x64xbf16>, vector<8x64xf32> -> vector<8x64xf32>
    %c0_3 = arith.constant 0 : index
    %c0_4 = arith.constant 0 : index
    %4 = vector.load %arg3[%c0_3, %c0_4] : memref<1x64xf32, #tpu.memory_space<vmem>>, vector<1x64xf32>
    %5 = vector.broadcast %4 : vector<1x64xf32> to vector<8x64xf32>
    %6 = arith.addf %3, %5 : vector<8x64xf32>
    %7 = math.tanh %6 : vector<8x64xf32>
    %8 = arith.truncf %7 : vector<8x64xf32> to vector<8x64xbf16>
    %c0_5 = arith.constant 0 : index
    %c0_6 = arith.constant 0 : index
    %9 = vector.load %arg4[%c0_5, %c0_6] : memref<64x64xbf16, #tpu.memory_space<vmem>>, vector<64x64xbf16>
    %cst_7 = arith.constant dense<0.000000e+00> : vector<8x64xf32>
    %10 = tpu.matmul %8, %9, %cst_7 {dimension_numbers = #tpu.dot_dimension_numbers<[1], [0], [0], [1], [0, 0, 1, 1], [], []>} : vector<8x64xbf16>, vector<64x64xbf16>, vector<8x64xf32> -> vector<8x64xf32>
    %c0_8 = arith.constant 0 : index
    %c0_9 = arith.constant 0 : index
    %11 = vector.load %arg5[%c0_8, %c0_9] : memref<1x64xf32, #tpu.memory_space<vmem>>, vector<1x64xf32>
    %12 = vector.broadcast %11 : vector<1x64xf32> to vector<8x64xf32>
    %13 = arith.addf %10, %12 : vector<8x64xf32>
    %14 = math.tanh %13 : vector<8x64xf32>
    %15 = arith.truncf %14 : vector<8x64xf32> to vector<8x64xbf16>
    %c0_10 = arith.constant 0 : index
    %c0_11 = arith.constant 0 : index
    %16 = vector.load %arg6[%c0_10, %c0_11] : memref<64x128xbf16, #tpu.memory_space<vmem>>, vector<64x128xbf16>
    %cst_12 = arith.constant dense<0.000000e+00> : vector<8x128xf32>
    %17 = tpu.matmul %15, %16, %cst_12 {dimension_numbers = #tpu.dot_dimension_numbers<[1], [0], [0], [1], [0, 0, 1, 1], [], []>} : vector<8x64xbf16>, vector<64x128xbf16>, vector<8x128xf32> -> vector<8x128xf32>
    %c0_13 = arith.constant 0 : index
    %c0_14 = arith.constant 0 : index
    %18 = vector.load %arg7[%c0_13, %c0_14] : memref<1x128xf32, #tpu.memory_space<vmem>>, vector<1x128xf32>
    %19 = vector.broadcast %18 : vector<1x128xf32> to vector<8x128xf32>
    %20 = arith.addf %17, %19 : vector<8x128xf32>
    %cst_15 = arith.constant dense<0xFF800000> : vector<8xf32>
    %21 = vector.multi_reduction <maximumf>, %20, %cst_15 [1] : vector<8x128xf32> to vector<8xf32>
    %22 = vector.shape_cast %21 : vector<8xf32> to vector<8x1xf32>
    %23 = vector.broadcast %22 : vector<8x1xf32> to vector<8x128xf32>
    %24 = arith.subf %20, %23 : vector<8x128xf32>
    %25 = math.exp %24 : vector<8x128xf32>
    %cst_16 = arith.constant dense<0.000000e+00> : vector<8xf32>
    %26 = vector.multi_reduction <add>, %25, %cst_16 [1] : vector<8x128xf32> to vector<8xf32>
    %27 = vector.shape_cast %26 : vector<8xf32> to vector<8x1xf32>
    %28 = tpu.reciprocal %27 {approx = true} : vector<8x1xf32> -> vector<8x1xf32>
    %29 = vector.broadcast %28 : vector<8x1xf32> to vector<8x128xf32>
    %30 = arith.mulf %25, %29 : vector<8x128xf32>
    %c0_17 = arith.constant 0 : index
    %c0_18 = arith.constant 0 : index
    %31 = vector.load %arg8[%c0_17, %c0_18] : memref<8x128xf32, #tpu.memory_space<vmem>>, vector<8x128xf32>
    tpu.vector_store %arg8[%c0_17, %c0_18], %30 {strides = array<i32>} : memref<8x128xf32, #tpu.memory_space<vmem>>, vector<8x128xf32>,
    return
  }
  func.func @transform_0(%arg0: i32) -> (i32, i32) {
    %c0_i32 = arith.constant 0 : i32
    %c0_i32_0 = arith.constant 0 : i32
    return %arg0, %c0_i32 : i32, i32
  }
  func.func @transform_1(%arg0: i32) -> (i32, i32) {
    %c0_i32 = arith.constant 0 : i32
    %c0_i32_0 = arith.constant 0 : i32
    %c0_i32_1 = arith.constant 0 : i32
    return %c0_i32, %c0_i32_0 : i32, i32
  }
  func.func @transform_2(%arg0: i32) -> (i32, i32) {
    %c0_i32 = arith.constant 0 : i32
    %c0_i32_0 = arith.constant 0 : i32
    %c0_i32_1 = arith.constant 0 : i32
    return %c0_i32, %c0_i32_0 : i32, i32
  }
  func.func @transform_3(%arg0: i32) -> (i32, i32) {
    %c0_i32 = arith.constant 0 : i32
    %c0_i32_0 = arith.constant 0 : i32
    %c0_i32_1 = arith.constant 0 : i32
    return %c0_i32, %c0_i32_0 : i32, i32
  }
  func.func @transform_4(%arg0: i32) -> (i32, i32) {
    %c0_i32 = arith.constant 0 : i32
    %c0_i32_0 = arith.constant 0 : i32
    %c0_i32_1 = arith.constant 0 : i32
    return %c0_i32, %c0_i32_0 : i32, i32
  }
  func.func @transform_5(%arg0: i32) -> (i32, i32) {
    %c0_i32 = arith.constant 0 : i32
    %c0_i32_0 = arith.constant 0 : i32
    %c0_i32_1 = arith.constant 0 : i32
    return %c0_i32, %c0_i32_0 : i32, i32
  }
  func.func @transform_6(%arg0: i32) -> (i32, i32) {
    %c0_i32 = arith.constant 0 : i32
    %c0_i32_0 = arith.constant 0 : i32
    %c0_i32_1 = arith.constant 0 : i32
    return %c0_i32, %c0_i32_0 : i32, i32
  }
  func.func @transform_7(%arg0: i32) -> (i32, i32) {
    %c0_i32 = arith.constant 0 : i32
    %c0_i32_0 = arith.constant 0 : i32
    return %arg0, %c0_i32 : i32, i32
  }
}

</mosaic_0001>

<bundles_post_ra>
// kernel: tpu_custom_call.1
= control target key start
LH: loop header
LB: loop body
LE: loop exit
PB: predicated region body
PF: predicated region fallthrough
CT: control target
= control target key end

     0   :  { %12 = vsyncpa [#allocation3], 0  ;;  %s710_s0 = inlined_call_operand.hbm [shape: f32[8,64], index: 0, kind: input, shape index: {}]   ;;  %s711_s1 = inlined_call_operand.hbm [shape: bf16[64,64], index: 1, kind: input, shape index: {}]   ;;  %s712_s2 = inlined_call_operand.vmem [shape: f32[1,64], index: 2, kind: input, shape index: {}]   ;;  %s713_s3 = inlined_call_operand.hbm [shape: bf16[64,64], index: 3, kind: input, shape index: {}]   ;;  %s714_s4 = inlined_call_operand.vmem [shape: f32[1,64], index: 4, kind: input, shape index: {}]   ;;  %s715_s5 = inlined_call_operand.hbm [shape: bf16[64,128], index: 5, kind: input, shape index: {}]   ;;  %s716_s6 = inlined_call_operand.vmem [shape: f32[1,128], index: 6, kind: input, shape index: {}]   ;;  %s717_s7 = inlined_call_operand.hbm [shape: f32[8,128], index: 7, kind: output, shape index: {}]  }
   0x1   :  { %13 = vsyncpa [#allocation6], 0 }
   0x2   :  { %14 = vsyncpa [#allocation9], 0 }
   0x3   :  { %15 = vsyncpa [#allocation4], 0  ;;  %s577_s24 = smov [#allocation5]   ;;  %s459_s28 = scalar_lea.hbm %s711_s1, 512 }
   0x4   :  { %s31_s25 = sshll.u32 %s577_s24, 4  ;;  %p460_p0 = scmp.ne.s32.totalorder %s711_s1, %s459_s28  ;;  %s32_s25 = int_to_ptr.vmem [resolvable:$true] %s31_s25 }
   0x5   :  { %p463_p1 = scmp.lt.u32.totalorder %s459_s28, %s711_s1 }
   0x7   :  { %p465_p2 = pnand %p463_p1, %p460_p0 }
   0x9   :  { %468 = shalt.err (!%p465_p2)
}
   0xa   :  { %s469_s10 = scalar_lea.vmem %s32_s25, 512  ;;  %p474_p4 = scmp.lt.s32.totalorder %s32_s25, %s32_s25 }
   0xb   :  { %p470_p3 = scmp.ne.s32.totalorder %s32_s25, %s469_s10  ;;  %p475_p5 = scmp.lt.s32.totalorder %s469_s10, %s469_s10 }
   0xd   :  { %p476_p6 = por %p475_p5, %p474_p4 }
   0xf   :  { %p477_p7 = pnand %p476_p6, %p470_p3 }
  0x11   :  { %480 = shalt.err (!%p477_p7)
}
  0x12   :  { %s578_s11 = smov 64   ;;  %s579_s12 = smov 4  }
  0x13   :  { %37 = dma.hbm_to_vmem [thread:$0]  %s711_s1, 512, %s32_s25, [#allocation6], %s578_s11, %s578_s11, %s579_s12  }
  0x14   :  { %s580_s15 = smov [#allocation2]   ;;  %s581_s17 = smov [#allocation7]  }
  0x15   :  { %s22_s16 = sshll.u32 %s580_s15, 4  ;;  %s45_s18 = sshll.u32 %s581_s17, 4  ;;  %s23_s16 = int_to_ptr.vmem [resolvable:$true] %s22_s16  ;;  %s46_s18 = int_to_ptr.vmem [resolvable:$true] %s45_s18 }
  0x16   :  { %s481_s21 = scalar_lea.hbm %s710_s0, 128 }
  0x17   :  { %p482_p8 = scmp.ne.s32.totalorder %s710_s0, %s481_s21  ;;  %p485_p9 = scmp.lt.u32.totalorder %s481_s21, %s710_s0 }
  0x19   :  { %p487_p10 = pnand %p485_p9, %p482_p8 }
  0x1b   :  { %490 = shalt.err (!%p487_p10)
}
  0x1c   :  { %s491_s1 = scalar_lea.vmem %s23_s16, 128  ;;  %p496_p12 = scmp.lt.s32.totalorder %s23_s16, %s23_s16 }
  0x1d   :  { %p492_p11 = scmp.ne.s32.totalorder %s23_s16, %s491_s1  ;;  %p497_p13 = scmp.lt.s32.totalorder %s491_s1, %s491_s1 }
  0x1f   :  { %p498_p0 = por %p497_p13, %p496_p12 }
  0x21   :  { %p499_p1 = pnand %p498_p0, %p492_p11 }
  0x23   :  { %502 = shalt.err (!%p499_p1)
}
  0x24   :  { %25 = dma.hbm_to_vmem [thread:$0]  %s710_s0, 128, %s23_s16, [#allocation3]  }
  0x25   :  { %s503_s30 = scalar_lea.hbm %s713_s3, 512 }
  0x26   :  { %p504_p2 = scmp.ne.s32.totalorder %s713_s3, %s503_s30  ;;  %p507_p3 = scmp.lt.u32.totalorder %s503_s30, %s713_s3 }
  0x28   :  { %p509_p4 = pnand %p507_p3, %p504_p2 }
  0x2a   :  { %512 = shalt.err (!%p509_p4)
}
  0x2b   :  { %s513_s14 = scalar_lea.vmem %s46_s18, 512  ;;  %p518_p6 = scmp.lt.s32.totalorder %s46_s18, %s46_s18 }
  0x2c   :  { %p514_p5 = scmp.ne.s32.totalorder %s46_s18, %s513_s14  ;;  %p519_p7 = scmp.lt.s32.totalorder %s513_s14, %s513_s14 }
  0x2e   :  { %p520_p8 = por %p519_p7, %p518_p6 }
  0x30   :  { %p521_p9 = pnand %p520_p8, %p514_p5 }
  0x32   :  { %524 = shalt.err (!%p521_p9)
}
  0x33   :  { %51 = dma.hbm_to_vmem [thread:$0]  %s713_s3, 512, %s46_s18, [#allocation6], %s578_s11, %s578_s11, %s579_s12  }
  0x34   :  { %s582_s16 = smov [#allocation8]   ;;  %s525_s21 = scalar_lea.hbm %s715_s5, 512 }
  0x35   :  { %s59_s17 = sshll.u32 %s582_s16, 4  ;;  %p526_p10 = scmp.ne.s32.totalorder %s715_s5, %s525_s21  ;;  %s60_s17 = int_to_ptr.vmem [resolvable:$true] %s59_s17 }
  0x36   :  { %p529_p11 = scmp.lt.u32.totalorder %s525_s21, %s715_s5 }
  0x38   :  { %p531_p12 = pnand %p529_p11, %p526_p10 }
  0x3a   :  { %534 = shalt.err (!%p531_p12)
}
  0x3b   :  { %s535_s1 = scalar_lea.vmem %s60_s17, 512  ;;  %p540_p0 = scmp.lt.s32.totalorder %s60_s17, %s60_s17 }
  0x3c   :  { %p536_p13 = scmp.ne.s32.totalorder %s60_s17, %s535_s1  ;;  %p541_p1 = scmp.lt.s32.totalorder %s535_s1, %s535_s1 }
  0x3e   :  { %p542_p2 = por %p541_p1, %p540_p0 }
  0x40   :  { %p543_p3 = pnand %p542_p2, %p536_p13 }
  0x42   :  { %546 = shalt.err (!%p543_p3)
}
  0x43   :  { %65 = dma.hbm_to_vmem [thread:$0]  %s715_s5, 512, %s60_s17, [#allocation9], %s578_s11, %s578_s11, %s579_s12  }
  0x44   :  { %569 = dma.done.wait [#allocation3], 128  }
  0x45   :  { %570 = vsyncadd [#allocation3], 4294967168 }
  0x46   :  { %571 = dma.done.wait [#allocation6], 1024  }
  0x47   :  { %572 = vsyncadd [#allocation6], 4294966272 }
  0x48   :  { %573 = dma.done.wait [#allocation9], 512  }
  0x49   :  { %574 = vsyncadd [#allocation9], 4294966784  ;;  %v583_v0 = vmov 0.0   ;;  %vm584_vm0 = vmmov 0   ;;  %v439_v1 = vld [vmem:[#allocation5] sm:$0xff]   ;;  %v440_v2 = vld [vmem:[#allocation5 + $0x8] sm:$0xff]  }
  0x4a   :  { %394 = vmatprep.subr.bf16.mxu0 %v583_v0  ;;  %402 = vmatprep.mubr.msk.bf16.mxu0 %vm584_vm0, %v583_v0  ;;  %v441_v3 = vld [vmem:[#allocation5 + $0x10] sm:$0xff]   ;;  %v442_v4 = vld [vmem:[#allocation5 + $0x18] sm:$0xff]   ;;  %vm122_vm1 = vcmask 523264   ;;  %v443_v7 = vld [vmem:[#allocation7] sm:$0xff]  }
  0x4b   :  { %406 = vmatprep.subr.bf16.mxu1 %v583_v0  ;;  %414 = vmatprep.mubr.msk.bf16.mxu1 %vm584_vm0, %v583_v0  ;;  %v81_v5 = vld [vmem:[#allocation2] sm:$0xff]  ;;  %v444_v8 = vld [vmem:[#allocation7 + $0x8] sm:$0xff]   ;;  %v445_v9 = vld [vmem:[#allocation7 + $0x10] sm:$0xff]  }
  0x4c   :  { %395 = vmatpush3.bf16.msra.mxu0 %v439_v1  ;;  %v82_v6 = vpack.c.bf16 %v81_v5, %v81_v5  ;;  %407 = vmatpush3.bf16.msra.mxu1 %v443_v7  ;;  %v446_v10 = vld [vmem:[#allocation7 + $0x18] sm:$0xff]   ;;  %v447_v19 = vld [vmem:[#allocation8] sm:$0xff]   ;;  %v448_v20 = vld [vmem:[#allocation8 + $0x8] sm:$0xff]  }
  0x4d   :  { %396 = vmatprep.subr.bf16.mxu0 %v583_v0  ;;  %408 = vmatprep.subr.bf16.mxu1 %v583_v0  ;;  %v361_v11 = vld [vmem:[%s712_s2] ss:$0 sm:$0xff]  ;;  %v449_v21 = vld [vmem:[#allocation8 + $0x10] sm:$0xff]  }
  0x4e   :  { %v450_v22 = vld [vmem:[#allocation8 + $0x18] sm:$0xff]  }
  0x4f   :  { %v367_v23 = vld [vmem:[%s714_s4] ss:$0 sm:$0xff]  ;;  %s585_s4 = smov [#allocation10]  }
  0x50   :  { %397 = vmatpush3.bf16.msra.mxu0 %v440_v2  ;;  %409 = vmatpush3.bf16.msra.mxu1 %v444_v8  ;;  %v373_v31 = vld [vmem:[%s716_s6] ss:$0 sm:$0xff]  ;;  %s350_s28 = sshll.u32 %s585_s4, 4  ;;  %s351_s28 = int_to_ptr.vmem [resolvable:$true] %s350_s28 }
  0x51   :  { %398 = vmatprep.subr.bf16.mxu0 %v583_v0  ;;  %410 = vmatprep.subr.bf16.mxu1 %v583_v0  ;;  %s547_s6 = scalar_lea.vmem %s351_s28, 128  ;;  %p552_p5 = scmp.lt.s32.totalorder %s351_s28, %s351_s28 }
  0x52   :  { %p548_p4 = scmp.ne.s32.totalorder %s351_s28, %s547_s6  ;;  %p553_p6 = scmp.lt.s32.totalorder %s547_s6, %s547_s6 }
  0x54   :  { %399 = vmatpush3.bf16.msra.mxu0 %v441_v3  ;;  %411 = vmatpush3.bf16.msra.mxu1 %v445_v9  ;;  %p554_p7 = por %p553_p6, %p552_p5 }
  0x55   :  { %400 = vmatprep.subr.bf16.mxu0 %v583_v0  ;;  %412 = vmatprep.subr.bf16.mxu1 %v583_v0 }
  0x56   :  { %p555_p8 = pnand %p554_p7, %p548_p4 }
  0x58   :  { %401 = vmatpush3.bf16.msra.mxu0 %v442_v4  ;;  %413 = vmatpush3.bf16.msra.mxu1 %v446_v10 }
  0x59   :  { %418 = vmatprep.subr.bf16.mxu0 %v583_v0 }
  0x5b   :  { %403 = vmatmul.mubr.msk.bf16.vlgmr.msra.gmra.mrb[0].mxu0 %vm122_vm1, %v82_v6 }
  0x5c   :  { %426 = vmatprep.mubr.msk.bf16.mxu0 %vm584_vm0, %v583_v0  ;;  %419 = vmatpush3.bf16.msra.mxu0 %v447_v19 }
  0x5d   :  { %420 = vmatprep.subr.bf16.mxu0 %v583_v0 }
  0x60   :  { %421 = vmatpush3.bf16.msra.mxu0 %v448_v20 }
  0x61   :  { %422 = vmatprep.subr.bf16.mxu0 %v583_v0 }
  0x64   :  { %423 = vmatpush3.bf16.msra.mxu0 %v449_v21 }
  0x65   :  { %424 = vmatprep.subr.bf16.mxu0 %v583_v0 }
  0x68   :  { %425 = vmatpush3.bf16.msra.mxu0 %v450_v22 }
 0x12e   :  { %v160_v12 = vpop.f32.mrb[0].mxu0 }
 0x12f   :  { %v161_v13 = vadd.f32 %v361_v11, %v160_v12  ;;  %v404_v14 = vpop.f32.mrb[1].mxu0 }
 0x130   :  { %v163_v15 = vpop.f32.mrb[2].mxu0 }
 0x131   :  { %451 = vtanh.f32 %v161_v13  ;;  %v405_v16 = vpop.f32.mrb[3].mxu0 }
 0x13b   :  { %v452_v17 = vpop.eup %451 }
 0x13c   :  { %v167_v18 = vpack.c.bf16 %v452_v17, %v452_v17 }
 0x13e   :  { %415 = vmatmul.mubr.msk.bf16.vlgmr.msra.gmra.mrb[0].mxu1 %vm122_vm1, %v167_v18 }
 0x211   :  { %v244_v24 = vpop.f32.mrb[0].mxu1 }
 0x212   :  { %v245_v25 = vadd.f32 %v367_v23, %v244_v24  ;;  %v416_v26 = vpop.f32.mrb[1].mxu1 }
 0x213   :  { %v247_v27 = vpop.f32.mrb[2].mxu1 }
 0x214   :  { %453 = vtanh.f32 %v245_v25  ;;  %v417_v28 = vpop.f32.mrb[3].mxu1 }
 0x21e   :  { %v454_v29 = vpop.eup %453 }
 0x21f   :  { %v251_v30 = vpack.c.bf16 %v454_v29, %v454_v29 }
 0x221   :  { %427 = vmatmul.mubr.msk.bf16.vlgmr.msra.gmra.mrb[4].mxu0 %vm122_vm1, %v251_v30 }
 0x2f4   :  { %v328_v32 = vpop.f32.mrb[4].mxu0 }
 0x2f5   :  { %v329_v33 = vadd.f32 %v373_v31, %v328_v32  ;;  %v428_v34 = vpop.f32.mrb[5].mxu0 }
 0x2f6   :  { %v331_v35 = vpop.f32.mrb[6].mxu0 }
 0x2f7   :  { %334 = vmax.xlane.f32.xlu0 %v329_v33  ;;  %v429_v36 = vpop.f32.mrb[7].mxu0 }
 0x384   :  { %v335_v37 = vpop.xlane.xlu0 %334 }
 0x385   :  { %v336_v38 = vsub.f32 %v329_v33, %v335_v37 }
 0x387   :  { %v337_v39 = vmul.f32 1.442695, %v336_v38 }
 0x389   :  { %455 = vpow2.f32 %v337_v39 }
 0x393   :  { %v456_v40 = vpop.eup %455 }
 0x394   :  { %339 = vadd.xlane.f32.xlu0 %v456_v40 }
 0x421   :  { %v340_v41 = vpop.xlane.xlu0 %339 }
 0x422   :  { %457 = vrcp.f32 %v340_v41 }
 0x42c   :  { %v458_v42 = vpop.eup %457 }
 0x42d   :  { %v342_v43 = vmul.f32 %v458_v42, %v456_v40 }
 0x42f   :  { %343 = vst [vmem:[#allocation10] sm:$0xff] %v342_v43 }
 0x430   :  { %558 = shalt.err (!%p555_p8)
}
 0x431   :  { %s559_s8 = scalar_lea.hbm %s717_s7, 128 }
 0x432   :  { %p560_p9 = scmp.ne.s32.totalorder %s717_s7, %s559_s8  ;;  %p563_p10 = scmp.lt.u32.totalorder %s559_s8, %s717_s7 }
 0x434   :  { %p565_p11 = pnand %p563_p10, %p560_p9 }
 0x436   :  { %568 = shalt.err (!%p565_p11)
}
 0x437   :  { %353 = dma.vmem_to_hbm [thread:$0]  %s351_s28, 128, %s717_s7, [#allocation4]  }
 0x438   :  { %575 = dma.done.wait [#allocation4], 128  }
 0x439   :  { %576 = vsyncadd [#allocation4], 4294967168 }
 0x43a   :  { %357 = vsyncpa [#allocation3], 1 }
 0x43b   :  { %358 = vsyncpa [#allocation6], 1 }
 0x43c   :  { %359 = vsyncpa [#allocation9], 1 }
 0x43d   :  { %360 = vsyncpa [#allocation4], 1 }

</bundles_post_ra>
